<compile_context>
chip_gen: v5e
topology: v5e:2x2
jax: 0.10.0
libtpu: 0.0.40
codegen_flags: <defaults>
</compile_context>

<pallas_src>
import jax
import jax.numpy as jnp
from jax.experimental import pallas as pl
from jax.experimental.pallas import tpu as pltpu


def _cp_score_kernel(e_ref, wt_ref, o_ref):
    # e_ref  : (TB, R)  — fused (lhs * rel) query-side tile
    # wt_ref : (R, TN)  — rhs entity-embedding tile, pre-transposed (lane-dense N)
    # o_ref  : (TB, TN) — scores tile
    o_ref[...] = jnp.dot(
        e_ref[...], wt_ref[...], preferred_element_type=jnp.float32
    ).astype(o_ref.dtype)


def _round_up(x, m):
    return (x + m - 1) // m * m


def cp_scores(e, rhs_weight_t, *, tn=None, compute_dtype=None):
    """scores = e @ rhs_weight_t via Pallas.

    e: (B, R); rhs_weight_t: (R, N) (pre-transposed rhs table) -> (B, N) float32.
    Pads B / N internally; entity axis N is tiled on lanes.
    """
    B, R = e.shape
    _, N = rhs_weight_t.shape

    if compute_dtype is not None:
        e = e.astype(compute_dtype)
        rhs_weight_t = rhs_weight_t.astype(compute_dtype)
    bytes_per = jnp.dtype(e.dtype).itemsize

    # Batch tile: cover the whole (padded) batch if it fits the MXU rows,
    # otherwise 128-row tiles (saturates v5e's 4x128^2 MXU; fine on v6e/v7x).
    Bp = _round_up(B, 8)
    tb = Bp if Bp <= 256 else 128
    Bp = _round_up(Bp, tb)

    # Entity tile: big and lane-dense, but keep double-buffered (R, tn) weight
    # tiles comfortably inside the default scoped VMEM (also safe on v7x).
    Np = _round_up(N, 128)
    if tn is None:
        tn = 2048
        while tn > 128 and 2 * R * tn * bytes_per > (16 << 20):
            tn //= 2
    while tn > 128 and Np % tn != 0:
        tn //= 2
    Np = _round_up(Np, tn)

    if Bp != B:
        e = jnp.pad(e, ((0, Bp - B), (0, 0)))
    if Np != N:
        rhs_weight_t = jnp.pad(rhs_weight_t, ((0, 0), (0, Np - N)))

    # TODO(synk): for very large rank (R*tn tiles near the VMEM budget), split
    # R into a third "arbitrary" reduction grid axis with a VMEM accumulator.
    grid = (Np // tn, Bp // tb)  # entity axis outermost, batch innermost
    out = pl.pallas_call(
        _cp_score_kernel,
        out_shape=jax.ShapeDtypeStruct((Bp, Np), jnp.float32),
        grid_spec=pltpu.PrefetchScalarGridSpec(
            num_scalar_prefetch=0,
            grid=grid,
            in_specs=[
                # query tile: changes only with the (inner) batch index
                pl.BlockSpec((tb, R), lambda j, i: (i, 0)),
                # weight tile: constant across the inner batch axis -> fetched
                # from HBM once per entity tile and kept resident
                pl.BlockSpec((R, tn), lambda j, i: (0, j)),
            ],
            out_specs=pl.BlockSpec((tb, tn), lambda j, i: (i, j)),
        ),
        compiler_params=pltpu.CompilerParams(
            dimension_semantics=("parallel", "parallel"),
        ),
    )(e, rhs_weight_t)
    return out[:B, :N]


class CP:
    """JAX port of the PyTorch CP model (forward only)."""

    def __init__(self, sizes, rank, init_size=0.001, key=None):
        self.sizes = sizes
        self.rank = rank
        if key is None:
            key = jax.random.PRNGKey(0)
        k0, k1, k2 = jax.random.split(key, 3)
        # nn.Embedding default init is N(0, 1); the module scales by init_size.
        self.lhs_w = jax.random.normal(k0, (sizes[0], rank), jnp.float32) * init_size
        self.rel_w = jax.random.normal(k1, (sizes[1], rank), jnp.float32) * init_size
        self.rhs_w = jax.random.normal(k2, (sizes[2], rank), jnp.float32) * init_size
        # Lane-dense copy of the rhs table for the score matmul (built once).
        self.rhs_w_t = jnp.asarray(self.rhs_w.T)          # (R, N)

    def forward(self, x, *, compute_dtype=None):
        # x: (B, 3) int32 triples (lhs_id, rel_id, rhs_id)
        lhs = jnp.take(self.lhs_w, x[:, 0], axis=0)       # (B, R)  — gather glue
        rel = jnp.take(self.rel_w, x[:, 1], axis=0)       # (B, R)
        rhs = jnp.take(self.rhs_w, x[:, 2], axis=0)       # (B, R)
        e = lhs * rel                                     # hoisted CP factor product
        scores = cp_scores(e, self.rhs_w_t, compute_dtype=compute_dtype)
        return scores, [(lhs, rel, rhs)]


if __name__ == "__main__":
    key = jax.random.PRNGKey(0)
    sizes = (256, 64, 256)   # (n_lhs_entities, n_relations, n_rhs_entities)
    rank = 32
    B = 8

    model = CP(sizes, rank, init_size=0.001, key=key)

    kq = jax.random.PRNGKey(1)
    k_l, k_r, k_o = jax.random.split(kq, 3)
    queries = jnp.stack(
        [
            jax.random.randint(k_l, (B,), 0, sizes[0], dtype=jnp.int32),
            jax.random.randint(k_r, (B,), 0, sizes[1], dtype=jnp.int32),
            jax.random.randint(k_o, (B,), 0, sizes[2], dtype=jnp.int32),
        ],
        axis=1,
    )  # (B, 3)

    scores, (factors,) = model.forward(queries)
    scores = jax.block_until_ready(scores)

    # Cross-check against plain-JAX reference.
    lhs, rel, rhs = factors
    ref = (lhs * rel) @ model.rhs_w.T
    assert scores.shape == (B, sizes[2])
    assert jnp.allclose(scores, ref, rtol=1e-5, atol=1e-6)

    print("KERNEL_OK")
</pallas_src>

<mosaic_0001>
module attributes {stable_mosaic.version = 11 : i64} {
  func.func @_cp_score_kernel(%arg0: i32, %arg1: i32, %arg2: memref<8x32xf32, #tpu.memory_space<vmem>>, %arg3: memref<32x256xf32, #tpu.memory_space<vmem>>, %arg4: memref<8x256xf32, #tpu.memory_space<vmem>>) attributes {dimension_semantics = [#tpu.dimension_semantics<parallel>, #tpu.dimension_semantics<parallel>], iteration_bounds = array<i64: 1, 1>, scalar_prefetch = 0 : i64, scratch_operands = 0 : i64, tpu.core_type = #tpu.core_type<tc>, window_params = [{transform_indices = @transform_0, window_bounds = array<i64: 8, 32>}, {transform_indices = @transform_1, window_bounds = array<i64: 32, 256>}, {transform_indices = @transform_2, window_bounds = array<i64: 8, 256>}]} {
    %c0 = arith.constant 0 : index
    %c0_0 = arith.constant 0 : index
    %0 = vector.load %arg2[%c0, %c0_0] : memref<8x32xf32, #tpu.memory_space<vmem>>, vector<8x32xf32>
    %c0_1 = arith.constant 0 : index
    %c0_2 = arith.constant 0 : index
    %1 = vector.load %arg3[%c0_1, %c0_2] : memref<32x256xf32, #tpu.memory_space<vmem>>, vector<32x256xf32>
    %cst = arith.constant dense<0.000000e+00> : vector<8x256xf32>
    %2 = tpu.matmul %0, %1, %cst {dimension_numbers = #tpu.dot_dimension_numbers<[1], [0], [0], [1], [0, 0, 1, 1], [], []>} : vector<8x32xf32>, vector<32x256xf32>, vector<8x256xf32> -> vector<8x256xf32>
    %c0_3 = arith.constant 0 : index
    %c0_4 = arith.constant 0 : index
    %3 = vector.load %arg4[%c0_3, %c0_4] : memref<8x256xf32, #tpu.memory_space<vmem>>, vector<8x256xf32>
    tpu.vector_store %arg4[%c0_3, %c0_4], %2 {strides = array<i32>} : memref<8x256xf32, #tpu.memory_space<vmem>>, vector<8x256xf32>,
    return
  }
  func.func @transform_0(%arg0: i32, %arg1: i32) -> (i32, i32) {
    %c0_i32 = arith.constant 0 : i32
    %c0_i32_0 = arith.constant 0 : i32
    return %arg1, %c0_i32 : i32, i32
  }
  func.func @transform_1(%arg0: i32, %arg1: i32) -> (i32, i32) {
    %c0_i32 = arith.constant 0 : i32
    %c0_i32_0 = arith.constant 0 : i32
    return %c0_i32, %arg0 : i32, i32
  }
  func.func @transform_2(%arg0: i32, %arg1: i32) -> (i32, i32) {
    %c0_i32 = arith.constant 0 : i32
    return %arg1, %arg0 : i32, i32
  }
}

</mosaic_0001>

<bundles_post_ra>
// kernel: tpu_custom_call.1
= control target key start
LH: loop header
LB: loop body
LE: loop exit
PB: predicated region body
PF: predicated region fallthrough
CT: control target
= control target key end

     0   :  { %7 = vsyncpa [#allocation3], 0  ;;  %s229_s0 = inlined_call_operand.hbm [shape: f32[8,32], index: 0, kind: input, shape index: {}]   ;;  %s230_s1 = inlined_call_operand.hbm [shape: f32[32,256], index: 1, kind: input, shape index: {}]   ;;  %s231_s2 = inlined_call_operand.hbm [shape: f32[8,256], index: 2, kind: output, shape index: {}]  }
   0x1   :  { %8 = vsyncpa [#allocation6], 0 }
   0x2   :  { %9 = vsyncpa [#allocation4], 0  ;;  %s15_s11 = sshll.u32 %s229_s0, 4  ;;  %s200_s12 = smov [#allocation2]   ;;  %s16_s11 = int_to_ptr.hbm [resolvable:$true] %s15_s11 }
   0x3   :  { %s17_s13 = sshll.u32 %s200_s12, 4  ;;  %s25_s16 = sshll.u32 %s230_s1, 4  ;;  %s18_s13 = int_to_ptr.vmem [resolvable:$true] %s17_s13  ;;  %s26_s16 = int_to_ptr.hbm [resolvable:$true] %s25_s16 }
   0x4   :  { %20 = dma.hbm_to_vmem [thread:$0]  %s16_s11, 128, %s18_s13, [#allocation3]  }
   0x5   :  { %s201_s17 = smov [#allocation5]   ;;  %s202_s19 = smov 256  }
   0x6   :  { %s27_s18 = sshll.u32 %s201_s17, 4  ;;  %s203_s20 = smov 16   ;;  %s28_s18 = int_to_ptr.vmem [resolvable:$true] %s27_s18 }
   0x7   :  { %33 = dma.hbm_to_vmem [thread:$0]  %s26_s16, 1024, %s28_s18, [#allocation6], %s202_s19, %s202_s19, %s203_s20  }
   0x8   :  { %194 = dma.done.wait [#allocation3], 128  }
   0x9   :  { %195 = vsyncadd [#allocation3], 4294967168 }
   0xa   :  { %196 = dma.done.wait [#allocation6], 1024  }
   0xb   :  { %197 = vsyncadd [#allocation6], 4294966272  ;;  %v49_v0 = vld [vmem:[#allocation5 + $0x30] sm:$0xff]  ;;  %v50_v1 = vld [vmem:[#allocation5 + $0x38] sm:$0xff]  ;;  %vm51_vm0 = vcmask 261120   ;;  %s204_s0 = smov [#allocation7]  }
   0xc   :  { %v47_v2 = vld [vmem:[#allocation5 + $0x20] sm:$0xff]  ;;  %67 = vmatpush.msra.mxu0 %v49_v0  ;;  %87 = vmatpush.msra.mxu1 %v50_v1  ;;  %v48_v3 = vld [vmem:[#allocation5 + $0x28] sm:$0xff]  ;;  %v45_v4 = vld [vmem:[#allocation5 + $0x10] sm:$0xff]  ;;  %s102_s1 = sshll.u32 %s204_s0, 4  ;;  %s104_s23 = sshll.u32 %s231_s2, 4  ;;  %s103_s1 = int_to_ptr.vmem [resolvable:$true] %s102_s1  ;;  %s105_s23 = int_to_ptr.hbm [resolvable:$true] %s104_s23 }
   0xd   :  { %v46_v5 = vld [vmem:[#allocation5 + $0x18] sm:$0xff]  ;;  %v43_v6 = vld [vmem:[#allocation5] sm:$0xff]  ;;  %v44_v7 = vld [vmem:[#allocation5 + $0x8] sm:$0xff] }
   0xe   :  { %68 = vmatpush.msra.mxu0 %v47_v2  ;;  %88 = vmatpush.msra.mxu1 %v48_v3  ;;  %v42_v8 = vld [vmem:[#allocation2] sm:$0xff] }
  0x10   :  { %69 = vmatpush.msra.mxu0 %v45_v4  ;;  %89 = vmatpush.msra.mxu1 %v46_v5 }
  0x12   :  { %70 = vmatpush.msra.mxu0 %v43_v6  ;;  %90 = vmatpush.msra.mxu1 %v44_v7 }
  0x13   :  { %115 = vmatmul.msk.f32.vlgmr.msra.gmra.mxu0 %vm51_vm0, %v42_v8  ;;  %116 = vmatmul.msk.f32.vlgmr.msra.gmra.mxu1 %vm51_vm0, %v42_v8 }
  0x90   :  { %v72_v9 = vpop.f32.mrf.mxu0  ;;  %v92_v10 = vpop.f32.mrf.mxu1 }
  0x91   :  { %95 = vst [vmem:[#allocation7] sm:$0xff] %v72_v9 }
  0x92   :  { %96 = vst [vmem:[#allocation7 + $0x8] sm:$0xff] %v92_v10 }
  0x93   :  { %107 = dma.vmem_to_hbm [thread:$0]  %s103_s1, 256, %s105_s23, [#allocation4]  }
  0x94   :  { %198 = dma.done.wait [#allocation4], 256  }
  0x95   :  { %199 = vsyncadd [#allocation4], 4294967040 }
  0x96   :  { %112 = vsyncpa [#allocation3], 1 }
  0x97   :  { %113 = vsyncpa [#allocation6], 1 }
  0x98   :  { %114 = vsyncpa [#allocation4], 1 }

</bundles_post_ra>
